<compile_context>
chip_gen: v7x
topology: tpu7x:2x2x1
jax: 0.10.0
libtpu: 0.0.40
codegen_flags: <defaults>
</compile_context>

<pallas_src>
import functools

import jax
import jax.numpy as jnp
from jax import lax
from jax.experimental import pallas as pl
from jax.experimental.pallas import tpu as pltpu

SCALE = 0.09
EPS = 1e-6


def _round_up(v, m):
    return ((v + m - 1) // m) * m


def _cos_linear_kernel(x_ref, w_ref, xinv_ref, winv_ref, o_ref, *, compute_dtype):
    k = pl.program_id(2)

    @pl.when(k == 0)
    def _init():
        o_ref[...] = jnp.zeros_like(o_ref)

    x = x_ref[...]                      # (tm, tk)
    w = w_ref[...]                      # (tn, tk)
    if compute_dtype is not None:
        x = x.astype(compute_dtype)
        w = w.astype(compute_dtype)

    # Raw (un-normalized) x @ W^T on the MXU; contract dim 1 of both operands
    # so W is fed in its natural (outdim, indim) layout (no materialized W.T).
    # Accumulate directly into the resident f32 output block.
    o_ref[...] += lax.dot_general(
        x, w,
        dimension_numbers=(((1,), (1,)), ((), ())),
        preferred_element_type=jnp.float32,
    )

    @pl.when(k == pl.num_programs(2) - 1)
    def _finalize():
        # (tm, 1) * (1, tn) broadcast of the precomputed inverse norms with
        # 1/scale already folded into xinv.  Padded rows/cols carry inv == 0
        # and acc == 0, so they stay exactly 0.
        o_ref[...] *= xinv_ref[...] * winv_ref[...]


def cos_linear(x, weight, *, tm=1024, tn=512, tk=1024, compute_dtype=None):
    """x: (N, indim); weight: (outdim, indim) -> (N, outdim) float32 scores."""
    n, indim = x.shape
    outdim, indim_w = weight.shape
    assert indim == indim_w

    # Tiny per-row inverse norms, computed once with exact sqrt/divide to match
    # the PyTorch (||.|| + 1e-6) semantics; 1/scale folded into the x factor.
    xf = x.astype(jnp.float32)
    wf = weight.astype(jnp.float32)
    x_inv = (1.0 / (jnp.sqrt(jnp.sum(xf * xf, axis=1, keepdims=True)) + EPS)) * (1.0 / SCALE)
    w_inv = (1.0 / (jnp.sqrt(jnp.sum(wf * wf, axis=1)) + EPS))[None, :]

    # Pad to TPU-friendly extents.  Sub-32-bit inputs pack 2 rows per sublane,
    # so align the batch dim to 16 in that case.
    row_align = 8 if x.dtype.itemsize >= 4 else 16
    pn = _round_up(n, row_align)
    po = _round_up(outdim, 128)
    pk = _round_up(indim, 128)

    # Clamp tiles to the (padded) problem.  tm == padded batch whenever it
    # fits, so the (usually much larger) weight matrix streams from HBM once.
    tm = min(tm, pn)
    tn = min(tn, po)
    tk = min(tk, pk)

    # Keep >= 2 parallel grid iterations (preferably along j) when possible so
    # both TensorCores of a v7x megacore get disjoint W column blocks.
    gi_est = _round_up(pn, tm) // tm
    gj_est = _round_up(po, tn) // tn
    if gi_est * gj_est < 2 and po >= 256:
        tn = max(128, _round_up(po // 2, 128))

    pn = _round_up(pn, tm)
    po = _round_up(po, tn)
    pk = _round_up(pk, tk)

    x_p = x if (pn == n and pk == indim) else jnp.pad(x, ((0, pn - n), (0, pk - indim)))
    w_p = weight if (po == outdim and pk == indim) else jnp.pad(
        weight, ((0, po - outdim), (0, pk - indim)))
    xinv_p = x_inv if pn == n else jnp.pad(x_inv, ((0, pn - n), (0, 0)))
    winv_p = w_inv if po == outdim else jnp.pad(w_inv, ((0, 0), (0, po - outdim)))

    gi, gj, gk = pn // tm, po // tn, pk // tk
    itemsize = x_p.dtype.itemsize

    # Rough VMEM footprint: double-buffered input tiles + resident f32 output
    # block (+ its writeback buffer) + the tiny inverse-norm vectors.
    vmem_bytes = (2 * (tm * tk + tn * tk) * itemsize
                  + 2 * tm * tn * 4
                  + 2 * (tm + tn) * 4)
    vmem_limit = min(max(int(1.25 * vmem_bytes), 32 << 20), 64 << 20)

    kernel = functools.partial(_cos_linear_kernel, compute_dtype=compute_dtype)

    out_p = pl.pallas_call(
        kernel,
        out_shape=jax.ShapeDtypeStruct((pn, po), jnp.float32),
        grid=(gi, gj, gk),
        in_specs=[
            pl.BlockSpec((tm, tk), lambda i, j, k: (i, k)),   # x tile
            pl.BlockSpec((tn, tk), lambda i, j, k: (j, k)),   # W tile (natural layout)
            pl.BlockSpec((tm, 1), lambda i, j, k: (i, 0)),    # 1/(||x||+eps)/scale
            pl.BlockSpec((1, tn), lambda i, j, k: (0, j)),    # 1/(||W||+eps), lane-oriented
        ],
        out_specs=pl.BlockSpec((tm, tn), lambda i, j, k: (i, j)),
        compiler_params=pltpu.CompilerParams(
            dimension_semantics=("parallel", "parallel", "arbitrary"),
            vmem_limit_bytes=vmem_limit,
        ),
        cost_estimate=pl.CostEstimate(
            flops=2 * pn * po * pk,
            transcendentals=0,
            bytes_accessed=(pn * pk * itemsize * gj
                            + po * pk * itemsize * gi
                            + pn * po * 4
                            + (pn + po) * 4),
        ),
    )(x_p, w_p, xinv_p, winv_p)

    return out_p[:n, :outdim]


def cos_linear_ref(x, weight):
    # Pure-JAX reference mirroring the PyTorch module.
    x_norm = jnp.linalg.norm(x, axis=1, keepdims=True)
    x_n = x / (x_norm + EPS)
    w_norm = jnp.linalg.norm(weight, axis=1, keepdims=True)
    w_n = weight / (w_norm + EPS)
    return (x_n @ w_n.T) / SCALE


if __name__ == "__main__":
    key = jax.random.PRNGKey(0)
    k_x, k_w = jax.random.split(key)

    N, INDIM, OUTDIM = 8, 32, 16  # small shapes consistent with nn.Linear(indim, outdim)

    x = jax.random.normal(k_x, (N, INDIM), dtype=jnp.float32)
    # Deterministic "Kaiming-uniform-like" init for the linear weight (bias=False).
    bound = 1.0 / float(INDIM) ** 0.5
    weight = jax.random.uniform(
        k_w, (OUTDIM, INDIM), minval=-bound, maxval=bound, dtype=jnp.float32
    )

    out = jax.block_until_ready(cos_linear(x, weight))
    ref = cos_linear_ref(x, weight)

    assert out.shape == (N, OUTDIM)
    # Exact sqrt/divide path -> tight f32 tolerance.
    assert jnp.allclose(out, ref, atol=1e-3, rtol=1e-4), (
        "mismatch vs reference: max abs err = "
        f"{float(jnp.max(jnp.abs(out - ref)))}"
    )

    print("KERNEL_OK")
</pallas_src>

<mosaic_0001>
module attributes {stable_mosaic.version = 11 : i64} {
  func.func @_cos_linear_kernel(%arg0: i32, %arg1: i32, %arg2: i32, %arg3: memref<8x128xf32, #tpu.memory_space<vmem>>, %arg4: memref<128x128xf32, #tpu.memory_space<vmem>>, %arg5: memref<8x1xf32, #tpu.memory_space<vmem>>, %arg6: memref<1x128xf32, #tpu.memory_space<vmem>>, %arg7: memref<8x128xf32, #tpu.memory_space<vmem>>) attributes {dimension_semantics = [#tpu.dimension_semantics<parallel>, #tpu.dimension_semantics<parallel>, #tpu.dimension_semantics<arbitrary>], iteration_bounds = array<i64: 1, 1, 1>, scalar_prefetch = 0 : i64, scratch_operands = 0 : i64, tpu.core_type = #tpu.core_type<tc>, window_params = [{transform_indices = @transform_0, window_bounds = array<i64: 8, 128>}, {transform_indices = @transform_1, window_bounds = array<i64: 128, 128>}, {transform_indices = @transform_2, window_bounds = array<i64: 8, 1>}, {transform_indices = @transform_3, window_bounds = array<i64: 1, 128>}, {transform_indices = @transform_4, window_bounds = array<i64: 8, 128>}]} {
    %c0_i32 = arith.constant 0 : i32
    %0 = arith.cmpi eq, %arg2, %c0_i32 : i32
    %1 = arith.extui %0 : i1 to i32
    %c0_i32_0 = arith.constant 0 : i32
    %2 = arith.cmpi ne, %1, %c0_i32_0 : i32
    scf.if %2 {
      %cst_10 = arith.constant 0.000000e+00 : f32
      %12 = vector.broadcast %cst_10 : f32 to vector<8x128xf32>
      %c0_11 = arith.constant 0 : index
      %c0_12 = arith.constant 0 : index
      %13 = vector.load %arg7[%c0_11, %c0_12] : memref<8x128xf32, #tpu.memory_space<vmem>>, vector<8x128xf32>
      tpu.vector_store %arg7[%c0_11, %c0_12], %12 {strides = array<i32>} : memref<8x128xf32, #tpu.memory_space<vmem>>, vector<8x128xf32>,
    } else {
    }
    %c0 = arith.constant 0 : index
    %c0_1 = arith.constant 0 : index
    %3 = vector.load %arg3[%c0, %c0_1] : memref<8x128xf32, #tpu.memory_space<vmem>>, vector<8x128xf32>
    %c0_2 = arith.constant 0 : index
    %c0_3 = arith.constant 0 : index
    %4 = vector.load %arg4[%c0_2, %c0_3] : memref<128x128xf32, #tpu.memory_space<vmem>>, vector<128x128xf32>
    %c0_4 = arith.constant 0 : index
    %c0_5 = arith.constant 0 : index
    %5 = vector.load %arg7[%c0_4, %c0_5] : memref<8x128xf32, #tpu.memory_space<vmem>>, vector<8x128xf32>
    %cst = arith.constant dense<0.000000e+00> : vector<8x128xf32>
    %6 = tpu.matmul %3, %4, %cst {dimension_numbers = #tpu.dot_dimension_numbers<[1], [1], [0], [0], [0, 0, 1, 0], [], []>} : vector<8x128xf32>, vector<128x128xf32>, vector<8x128xf32> -> vector<8x128xf32>
    %7 = arith.addf %5, %6 : vector<8x128xf32>
    %c0_6 = arith.constant 0 : index
    %c0_7 = arith.constant 0 : index
    %8 = vector.load %arg7[%c0_6, %c0_7] : memref<8x128xf32, #tpu.memory_space<vmem>>, vector<8x128xf32>
    tpu.vector_store %arg7[%c0_6, %c0_7], %7 {strides = array<i32>} : memref<8x128xf32, #tpu.memory_space<vmem>>, vector<8x128xf32>,
    %c0_i32_8 = arith.constant 0 : i32
    %9 = arith.cmpi eq, %arg2, %c0_i32_8 : i32
    %10 = arith.extui %9 : i1 to i32
    %c0_i32_9 = arith.constant 0 : i32
    %11 = arith.cmpi ne, %10, %c0_i32_9 : i32
    scf.if %11 {
      %c0_10 = arith.constant 0 : index
      %c0_11 = arith.constant 0 : index
      %12 = vector.load %arg7[%c0_10, %c0_11] : memref<8x128xf32, #tpu.memory_space<vmem>>, vector<8x128xf32>
      %c0_12 = arith.constant 0 : index
      %c0_13 = arith.constant 0 : index
      %13 = vector.load %arg5[%c0_12, %c0_13] : memref<8x1xf32, #tpu.memory_space<vmem>>, vector<8x1xf32>
      %c0_14 = arith.constant 0 : index
      %c0_15 = arith.constant 0 : index
      %14 = vector.load %arg6[%c0_14, %c0_15] : memref<1x128xf32, #tpu.memory_space<vmem>>, vector<1x128xf32>
      %15 = vector.broadcast %13 : vector<8x1xf32> to vector<8x128xf32>
      %16 = vector.broadcast %14 : vector<1x128xf32> to vector<8x128xf32>
      %17 = arith.mulf %15, %16 : vector<8x128xf32>
      %18 = arith.mulf %12, %17 : vector<8x128xf32>
      %c0_16 = arith.constant 0 : index
      %c0_17 = arith.constant 0 : index
      %19 = vector.load %arg7[%c0_16, %c0_17] : memref<8x128xf32, #tpu.memory_space<vmem>>, vector<8x128xf32>
      tpu.vector_store %arg7[%c0_16, %c0_17], %18 {strides = array<i32>} : memref<8x128xf32, #tpu.memory_space<vmem>>, vector<8x128xf32>,
    } else {
    }
    return
  }
  func.func @transform_0(%arg0: i32, %arg1: i32, %arg2: i32) -> (i32, i32) {
    %c0_i32 = arith.constant 0 : i32
    return %arg0, %arg2 : i32, i32
  }
  func.func @transform_1(%arg0: i32, %arg1: i32, %arg2: i32) -> (i32, i32) {
    %c0_i32 = arith.constant 0 : i32
    return %arg1, %arg2 : i32, i32
  }
  func.func @transform_2(%arg0: i32, %arg1: i32, %arg2: i32) -> (i32, i32) {
    %c0_i32 = arith.constant 0 : i32
    %c0_i32_0 = arith.constant 0 : i32
    return %arg0, %c0_i32 : i32, i32
  }
  func.func @transform_3(%arg0: i32, %arg1: i32, %arg2: i32) -> (i32, i32) {
    %c0_i32 = arith.constant 0 : i32
    %c0_i32_0 = arith.constant 0 : i32
    return %c0_i32, %arg1 : i32, i32
  }
  func.func @transform_4(%arg0: i32, %arg1: i32, %arg2: i32) -> (i32, i32) {
    %c0_i32 = arith.constant 0 : i32
    return %arg0, %arg1 : i32, i32
  }
}

</mosaic_0001>

<bundles_post_ra>
// kernel: tpu_custom_call.1
= control target key start
LH: loop header
LB: loop body
LE: loop exit
PB: predicated region body
PF: predicated region fallthrough
CT: control target
= control target key end

     0   :  { %9 = vsyncpa [#allocation3], 0  ;;  %s362_s0 = inlined_call_operand.vmem [shape: f32[8,128], index: 0, kind: input, shape index: {}]   ;;  %s363_s1 = inlined_call_operand.hbm [shape: f32[128,128], index: 1, kind: input, shape index: {}]   ;;  %s364_s2 = inlined_call_operand.vmem [shape: f32[8,1], index: 2, kind: input, shape index: {}]   ;;  %s365_s3 = inlined_call_operand.vmem [shape: f32[1,128], index: 3, kind: input, shape index: {}]   ;;  %s366_s4 = inlined_call_operand.hbm [shape: f32[8,128], index: 4, kind: output, shape index: {}]  }
   0x1   :  { %10 = vsyncpa [#allocation4], 0  ;;  %s296_s15 = smov [#allocation2]   ;;  %s248_s19 = scalar_lea.hbm %s363_s1, 2048 }
   0x2   :  { %s18_s16 = sshll.u32 %s296_s15, 4  ;;  %p249_p0 = scmp.ne.s32.totalorder %s363_s1, %s248_s19  ;;  %s19_s16 = int_to_ptr.vmem [resolvable:$true] %s18_s16 }
   0x3   :  { %p252_p1 = scmp.lt.u32.totalorder %s248_s19, %s363_s1 }
   0x5   :  { %p254_p2 = pnand %p252_p1, %p249_p0 }
   0x7   :  { %257 = shalt.err (!%p254_p2)
}
   0x8   :  { %s258_s24 = scalar_lea.vmem %s19_s16, 2048  ;;  %p263_p4 = scmp.lt.s32.totalorder %s19_s16, %s19_s16 }
   0x9   :  { %p259_p3 = scmp.ne.s32.totalorder %s19_s16, %s258_s24  ;;  %p264_p5 = scmp.lt.s32.totalorder %s258_s24, %s258_s24 }
   0xb   :  { %p265_p6 = por %p264_p5, %p263_p4 }
   0xd   :  { %p266_p7 = pnand %p265_p6, %p259_p3 }
   0xf   :  { %269 = shalt.err (!%p266_p7)
}
  0x10   :  { %s297_s25 = smov 128   ;;  %s298_s26 = smov 8  }
  0x11   :  { %24 = dma.hbm_to_vmem [thread:$0]  %s363_s1, 2048, %s19_s16, [#allocation3], %s297_s25, %s297_s25, %s298_s26  }
  0x12   :  { %292 = dma.done.wait [#allocation3], 2048  }
  0x13   :  { %293 = vsyncadd [#allocation3], 4294965248  ;;  %v299_v0 = vmov 0.0|0.0   ;;  %vm300_vm0 = vmmov 0   ;;  %v301_v1 = vmov 0.0   ;;  %v302_v2 = vmov 0  }
  0x14   :  { %215 = vmatprep.subr.bf16.mxu0 %v299_v0  ;;  %212 = vmatprep.mubr.msk.f32.mxu0 %vm300_vm0, %v301_v1  ;;  %v38_v3 = vld [vmem:[#allocation2] sm:$0xff]  ;;  %v39_v4 = vld [vmem:[#allocation2 + $0x8] sm:$0xff]  ;;  %v40_v6 = vld [vmem:[#allocation2 + $0x10] sm:$0xff]  ;;  %s303_s7 = smov [#allocation5]  }
  0x15   :  { %247 = vset.pattern.permute.xlu0 %v302_v2  ;;  %v216_v5 = vpack.c.bf16 %v39_v4, %v38_v3  ;;  %v41_v7 = vld [vmem:[#allocation2 + $0x18] sm:$0xff]  ;;  %v131_v8 = vld [vmem:[%s364_s2] sm:$0xff]  ;;  %v43_v11 = vld [vmem:[#allocation2 + $0x28] sm:$0xff]  ;;  %s153_s8 = sshll.u32 %s303_s7, 4  ;;  %s154_s8 = int_to_ptr.vmem [resolvable:$true] %s153_s8 }
  0x16   :  { %135 = vperm.xlu0 %247, %v131_v8   ;;  %v219_v9 = vpack.c.bf16 %v41_v7, %v40_v6  ;;  %v42_v10 = vld [vmem:[#allocation2 + $0x20] sm:$0xff]  ;;  %v44_v13 = vld [vmem:[#allocation2 + $0x30] sm:$0xff]  ;;  %v45_v14 = vld [vmem:[#allocation2 + $0x38] sm:$0xff]  ;;  %s270_s9 = scalar_lea.vmem %s154_s8, 128  ;;  %p275_p9 = scmp.lt.s32.totalorder %s154_s8, %s154_s8 }
  0x17   :  { %217 = vmatpush3.bf16.xpose.msra.mxu0 %v216_v5  ;;  %v222_v12 = vpack.c.bf16 %v43_v11, %v42_v10  ;;  %v225_v15 = vpack.c.bf16 %v45_v14, %v44_v13  ;;  %v46_v16 = vld [vmem:[#allocation2 + $0x40] sm:$0xff]  ;;  %v47_v17 = vld [vmem:[#allocation2 + $0x48] sm:$0xff]  ;;  %v48_v19 = vld [vmem:[#allocation2 + $0x50] sm:$0xff]  ;;  %p271_p8 = scmp.ne.s32.totalorder %s154_s8, %s270_s9  ;;  %p276_p10 = scmp.lt.s32.totalorder %s270_s9, %s270_s9 }
  0x18   :  { %218 = vmatprep.subr.bf16.mxu0 %v299_v0  ;;  %v228_v18 = vpack.c.bf16 %v47_v17, %v46_v16  ;;  %v49_v20 = vld [vmem:[#allocation2 + $0x58] sm:$0xff]  ;;  %v50_v22 = vld [vmem:[#allocation2 + $0x60] sm:$0xff]  ;;  %v51_v23 = vld [vmem:[#allocation2 + $0x68] sm:$0xff] }
  0x19   :  { %v231_v21 = vpack.c.bf16 %v49_v20, %v48_v19  ;;  %v234_v24 = vpack.c.bf16 %v51_v23, %v50_v22  ;;  %v52_v25 = vld [vmem:[#allocation2 + $0x70] sm:$0xff]  ;;  %v53_v26 = vld [vmem:[#allocation2 + $0x78] sm:$0xff]  ;;  %v37_v28 = vld [vmem:[%s362_s0] sm:$0xff]  ;;  %p277_p11 = por %p276_p10, %p275_p9 }
  0x1a   :  { %v237_v27 = vpack.c.bf16 %v53_v26, %v52_v25  ;;  %v162_v29 = vld [vmem:[%s365_s3] ss:$0 sm:$0xff] }
  0x1b   :  { %p278_p12 = pnand %p277_p11, %p271_p8 }
  0x1f   :  { %220 = vmatpush3.bf16.xpose.msra.mxu0 %v219_v9 }
  0x20   :  { %221 = vmatprep.subr.bf16.mxu0 %v299_v0 }
  0x27   :  { %223 = vmatpush3.bf16.xpose.msra.mxu0 %v222_v12 }
  0x28   :  { %224 = vmatprep.subr.bf16.mxu0 %v299_v0 }
  0x2f   :  { %226 = vmatpush3.bf16.xpose.msra.mxu0 %v225_v15 }
  0x30   :  { %227 = vmatprep.subr.bf16.mxu0 %v299_v0 }
  0x37   :  { %229 = vmatpush3.bf16.xpose.msra.mxu0 %v228_v18 }
  0x38   :  { %230 = vmatprep.subr.bf16.mxu0 %v299_v0 }
  0x3f   :  { %232 = vmatpush3.bf16.xpose.msra.mxu0 %v231_v21 }
  0x40   :  { %233 = vmatprep.subr.bf16.mxu0 %v299_v0 }
  0x47   :  { %235 = vmatpush3.bf16.xpose.msra.mxu0 %v234_v24 }
  0x48   :  { %236 = vmatprep.subr.bf16.mxu0 %v299_v0 }
  0x4f   :  { %238 = vmatpush3.bf16.xpose.msra.mxu0 %v237_v27 }
  0x56   :  { %213 = vmatmul.mubr.f32.vlgmr.msra.gmra.mrb[0].mxu0 %v37_v28 }
  0x95   :  { %v136_v30 = vpop.permute.xlu0 %135 }
  0x96   :  { %v144_v31 = vmul.f32 %v162_v29, %v136_v30 }
 0x129   :  { %v121_v32 = vpop.f32.mrb[0].mxu0 }
 0x12a   :  { %v214_v33 = vpop.f32.mrb[1].mxu0  ;;  %v145_v34 = vmul.f32 %v144_v31, %v121_v32 }
 0x12c   :  { %146 = vst [vmem:[#allocation5] sm:$0xff] %v145_v34 }
 0x12d   :  { %281 = shalt.err (!%p278_p12)
}
 0x12e   :  { %s282_s3 = scalar_lea.hbm %s366_s4, 128 }
 0x12f   :  { %p283_p13 = scmp.ne.s32.totalorder %s366_s4, %s282_s3  ;;  %p286_p0 = scmp.lt.u32.totalorder %s282_s3, %s366_s4 }
 0x131   :  { %p288_p1 = pnand %p286_p0, %p283_p13 }
 0x133   :  { %291 = shalt.err (!%p288_p1)
}
 0x134   :  { %156 = dma.vmem_to_hbm [thread:$0]  %s154_s8, 128, %s366_s4, [#allocation4]  }
 0x135   :  { %294 = dma.done.wait [#allocation4], 128  }
 0x136   :  { %295 = vsyncadd [#allocation4], 4294967168 }
 0x137   :  { %160 = vsyncpa [#allocation3], 1 }
 0x138   :  { %161 = vsyncpa [#allocation4], 1 }

</bundles_post_ra>
